<compile_context>
chip_gen: v7x
topology: tpu7x:2x2x1
jax: 0.10.0
libtpu: 0.0.40
codegen_flags: <defaults>
</compile_context>

<pallas_src>
import jax
import jax.numpy as jnp
from jax.experimental import pallas as pl
from jax.experimental.pallas import tpu as pltpu


def _gat_kernel(num_heads):
    inv_h = 1.0 / float(num_heads)

    def kernel(adj_ref, he_ref, et_ref, hmean_ref, out_ref):
        # adj_ref   : [TM, N]        int8 (0/1 mask)           -- pipelined row tile
        # he_ref    : [H, N, Fout]   bf16, he[g,j] = E[g,j]*h[j]  (resident)
        # et_ref    : [N, H]         bf16, E[g,j] = exp(s2[g,j]-max_g) (resident)
        # hmean_ref : [1, Fout]      f32 , mean_j h[j]           (resident, masked-row fallback)
        # out_ref   : [TM, Fout]     f32
        mask = adj_ref[...].astype(jnp.bfloat16)                      # exact 0/1, cast once

        # Per-head softmax denominators for all heads in one matmul: d[i,g] = sum_j mask*E.
        d = jnp.dot(mask, et_ref[...], preferred_element_type=jnp.float32)   # [TM, H]
        d = jnp.where(d > 0.0, d, 1.0)        # guard fully-masked rows (numerator is 0 there)
        w = inv_h / d                         # mean over heads folded in    # [TM, H]

        # out[i] = sum_g w[i,g] * sum_j mask[i,j] * E[g,j] * h[j]  == mean_g(softmax) @ h.
        # Per-head temporaries are only [TM, Fout]; static unroll is fine for small H.
        acc = None
        for g in range(num_heads):
            y = jnp.dot(mask, he_ref[g], preferred_element_type=jnp.float32)  # [TM, Fout]
            contrib = y * w[:, g:g + 1]
            acc = contrib if acc is None else acc + contrib

        # Reference semantics for fully-masked rows: uniform 1/N attention -> mean of h.
        row_any = jnp.max(mask, axis=-1, keepdims=True)                       # [TM, 1]
        out = jnp.where(row_any > 0.0, acc, hmean_ref[...])
        out_ref[...] = out.astype(out_ref.dtype)

    return kernel


def _vmem_budget_bytes():
    """Generation-aware VMEM budget (128 MiB on v5e/v6e, 64 MiB on v7x), with headroom."""
    cap = 64 * 1024 * 1024  # safe default (v7x per-core VMEM)
    try:
        cap = int(pltpu.get_tpu_info().vmem_capacity_bytes)
    except Exception:
        pass
    return max(32 * 1024 * 1024, int(cap * 0.70))


def _pick_tile_m(N, Fout, H, budget_bytes):
    """Largest row tile (multiple of 32 for int8 sublane packing) that fits the budget."""
    # resident: hE (bf16) + E (bf16) + h_mean (f32)
    fixed = 2 * H * N * Fout + 2 * N * H + 4 * Fout
    for tm in (2048, 1024, 512, 256, 128, 64, 32):
        if N % tm != 0:
            continue
        # double-buffered int8 adj tile + bf16 mask temp + out/acc/y f32 tiles (with margin)
        per_tile = 4 * tm * N + 24 * tm * Fout
        if fixed + per_tile <= budget_bytes:
            return tm
    if N % 32 == 0:
        return 32
    return N  # tiny graphs: single full-row tile (block == full dims is always legal)


def graph_attention_layer(features, adj_matrix, W, attention, *, tile_m=None):
    """features: [N, Fin] f32, adj_matrix: [N, N] f32, W: [Fin, Fout],
    attention: [H, 2*Fout, 1].  Returns [N, Fout] f32."""
    N, Fin = features.shape
    Fout = W.shape[1]
    H = attention.shape[0]

    att2d = attention.reshape(H, 2 * Fout)
    a2 = att2d[:, Fout:]           # the a1 half is constant along the softmax axis -> cancels

    # ---- one-time precompute, hoisted out of the kernel (plain XLA, f32) ----
    h = features.astype(jnp.float32) @ W.astype(jnp.float32)             # [N, Fout]
    s2 = h @ a2.astype(jnp.float32).T                                    # [N, H], s2[j,g]=h[j].a2[g]
    E = jnp.exp(s2 - jnp.max(s2, axis=0, keepdims=True))                 # [N, H], per-head shift
    hE = (E.T[:, :, None] * h[None, :, :]).astype(jnp.bfloat16)          # [H, N, Fout]
    Et = E.astype(jnp.bfloat16)                                          # [N, H]
    h_mean = jnp.mean(h, axis=0, keepdims=True)                          # [1, Fout]
    adj_i8 = (adj_matrix > 0).astype(jnp.int8)                           # narrow O(N^2) stream

    budget = _vmem_budget_bytes()
    if tile_m is None:
        tile_m = _pick_tile_m(N, Fout, H, budget)
    assert N % tile_m == 0, (N, tile_m)
    grid = (N // tile_m,)

    cost = pl.CostEstimate(
        flops=int(2 * H * N * N * (Fout + 1) + 4 * H * N * Fout),
        transcendentals=0,
        bytes_accessed=int(N * N + 2 * H * N * Fout + 2 * N * H + 4 * Fout + 4 * N * Fout),
    )

    return pl.pallas_call(
        _gat_kernel(H),
        out_shape=jax.ShapeDtypeStruct((N, Fout), jnp.float32),
        grid_spec=pltpu.PrefetchScalarGridSpec(
            num_scalar_prefetch=0,
            grid=grid,
            in_specs=[
                pl.BlockSpec((tile_m, N), lambda i: (i, 0)),        # adj row tile (pipelined)
                pl.BlockSpec((H, N, Fout), lambda i: (0, 0, 0)),    # E*h   (resident)
                pl.BlockSpec((N, H), lambda i: (0, 0)),             # E     (resident)
                pl.BlockSpec((1, Fout), lambda i: (0, 0)),          # mean(h) (resident)
            ],
            out_specs=pl.BlockSpec((tile_m, Fout), lambda i: (i, 0)),
        ),
        compiler_params=pltpu.CompilerParams(
            # No cross-step scratch any more -> row axis can shard across TensorCores.
            dimension_semantics=("parallel",),
            vmem_limit_bytes=budget,
        ),
        cost_estimate=cost,
    )(adj_i8, hE, Et, h_mean)


def _reference(features, adj_matrix, W, attention):
    """Pure-JAX f32 mirror of the PyTorch forward (dropout = identity)."""
    Fout = W.shape[1]
    H = attention.shape[0]
    h = features @ W                                                   # [N, Fout]
    att = attention.reshape(H, 2 * Fout)
    a1, a2 = att[:, :Fout], att[:, Fout:]
    e = (h @ a1.T).T[:, :, None] + (h @ a2.T).T[:, None, :]            # [H, N, N]
    e = jnp.where(adj_matrix[None] > 0, e, -9e15)
    attn = jax.nn.softmax(e, axis=-1)
    return jnp.mean(attn, axis=0) @ h


if __name__ == "__main__":
    # Small deterministic problem: N nodes, Fin -> Fout features, H heads.
    N, Fin, Fout, H = 64, 48, 64, 4
    key = jax.random.PRNGKey(0)
    k_feat, k_adj, k_w, k_att = jax.random.split(key, 4)

    features = jax.random.normal(k_feat, (N, Fin), dtype=jnp.float32)

    # Random 0/1 adjacency with self-loops.
    adj = (jax.random.uniform(k_adj, (N, N)) < 0.3).astype(jnp.float32)
    adj = jnp.maximum(adj, jnp.eye(N, dtype=jnp.float32))

    # Xavier-uniform init (deterministic), matching nn.init.xavier_uniform_ bounds.
    w_bound = (6.0 / (Fin + Fout)) ** 0.5
    W = jax.random.uniform(k_w, (Fin, Fout), minval=-w_bound, maxval=w_bound,
                           dtype=jnp.float32)
    a_bound = (6.0 / (2 * Fout + H)) ** 0.5
    attention = jax.random.uniform(k_att, (H, 2 * Fout, 1), minval=-a_bound,
                                   maxval=a_bound, dtype=jnp.float32)

    # tile_m=32 -> grid=(2,) to exercise the multi-step pipeline (and int8 sublane packing).
    out = graph_attention_layer(features, adj, W, attention, tile_m=32)
    out = jax.block_until_ready(out)

    ref = _reference(features, adj, W, attention)
    assert out.shape == (N, Fout)
    max_err = float(jnp.max(jnp.abs(out - ref)))
    # bf16 MXU inputs (E, E*h) vs the f32 reference -> relaxed tolerance.
    assert jnp.allclose(out, ref, atol=5e-2, rtol=5e-2), max_err

    print("KERNEL_OK")
</pallas_src>

<mosaic_0001>
module attributes {stable_mosaic.version = 11 : i64} {
  func.func @kernel(%arg0: i32, %arg1: memref<32x64xi8, #tpu.memory_space<vmem>>, %arg2: memref<4x64x64xbf16, #tpu.memory_space<vmem>>, %arg3: memref<64x4xbf16, #tpu.memory_space<vmem>>, %arg4: memref<1x64xf32, #tpu.memory_space<vmem>>, %arg5: memref<32x64xf32, #tpu.memory_space<vmem>>) attributes {dimension_semantics = [#tpu.dimension_semantics<parallel>], iteration_bounds = array<i64: 2>, scalar_prefetch = 0 : i64, scratch_operands = 0 : i64, tpu.core_type = #tpu.core_type<tc>, window_params = [{transform_indices = @transform_0, window_bounds = array<i64: 32, 64>}, {pipeline_mode = #tpu.pipeline_mode<synchronous>, transform_indices = @transform_1, window_bounds = array<i64: 4, 64, 64>}, {pipeline_mode = #tpu.pipeline_mode<synchronous>, transform_indices = @transform_2, window_bounds = array<i64: 64, 4>}, {pipeline_mode = #tpu.pipeline_mode<synchronous>, transform_indices = @transform_3, window_bounds = array<i64: 1, 64>}, {transform_indices = @transform_4, window_bounds = array<i64: 32, 64>}]} {
    %c0 = arith.constant 0 : index
    %c0_0 = arith.constant 0 : index
    %0 = vector.load %arg1[%c0, %c0_0] : memref<32x64xi8, #tpu.memory_space<vmem>>, vector<32x64xi8>
    %1 = arith.sitofp %0 : vector<32x64xi8> to vector<32x64xbf16>
    %c0_1 = arith.constant 0 : index
    %c0_2 = arith.constant 0 : index
    %2 = vector.load %arg3[%c0_1, %c0_2] : memref<64x4xbf16, #tpu.memory_space<vmem>>, vector<64x4xbf16>
    %cst = arith.constant dense<0.000000e+00> : vector<32x4xf32>
    %3 = tpu.matmul %1, %2, %cst {dimension_numbers = #tpu.dot_dimension_numbers<[1], [0], [0], [1], [0, 0, 1, 1], [], []>} : vector<32x64xbf16>, vector<64x4xbf16>, vector<32x4xf32> -> vector<32x4xf32>
    %cst_3 = arith.constant 0.000000e+00 : f32
    %4 = vector.broadcast %cst_3 : f32 to vector<32x4xf32>
    %5 = arith.cmpf ogt, %3, %4 : vector<32x4xf32>
    %cst_4 = arith.constant 1.000000e+00 : f32
    %6 = vector.broadcast %cst_4 : f32 to vector<32x4xf32>
    %7 = arith.select %5, %3, %6 : vector<32x4xi1>, vector<32x4xf32>
    %cst_5 = arith.constant 2.500000e-01 : f32
    %8 = vector.broadcast %cst_5 : f32 to vector<32x4xf32>
    %9 = arith.divf %8, %7 : vector<32x4xf32>
    %c0_6 = arith.constant 0 : index
    %c0_7 = arith.constant 0 : index
    %c0_8 = arith.constant 0 : index
    %10 = vector.load %arg2[%c0_6, %c0_7, %c0_8] : memref<4x64x64xbf16, #tpu.memory_space<vmem>>, vector<1x64x64xbf16>
    %11 = vector.shape_cast %10 : vector<1x64x64xbf16> to vector<64x64xbf16>
    %cst_9 = arith.constant dense<0.000000e+00> : vector<32x64xf32>
    %12 = tpu.matmul %1, %11, %cst_9 {dimension_numbers = #tpu.dot_dimension_numbers<[1], [0], [0], [1], [0, 0, 1, 1], [], []>} : vector<32x64xbf16>, vector<64x64xbf16>, vector<32x64xf32> -> vector<32x64xf32>
    %13 = vector.extract_strided_slice %9 {offsets = [0, 0], sizes = [32, 1], strides = [1, 1]} : vector<32x4xf32> to vector<32x1xf32>
    %14 = vector.broadcast %13 : vector<32x1xf32> to vector<32x64xf32>
    %15 = arith.mulf %12, %14 : vector<32x64xf32>
    %c1 = arith.constant 1 : index
    %c0_10 = arith.constant 0 : index
    %c0_11 = arith.constant 0 : index
    %16 = vector.load %arg2[%c1, %c0_10, %c0_11] : memref<4x64x64xbf16, #tpu.memory_space<vmem>>, vector<1x64x64xbf16>
    %17 = vector.shape_cast %16 : vector<1x64x64xbf16> to vector<64x64xbf16>
    %cst_12 = arith.constant dense<0.000000e+00> : vector<32x64xf32>
    %18 = tpu.matmul %1, %17, %cst_12 {dimension_numbers = #tpu.dot_dimension_numbers<[1], [0], [0], [1], [0, 0, 1, 1], [], []>} : vector<32x64xbf16>, vector<64x64xbf16>, vector<32x64xf32> -> vector<32x64xf32>
    %19 = vector.extract_strided_slice %9 {offsets = [0, 1], sizes = [32, 1], strides = [1, 1]} : vector<32x4xf32> to vector<32x1xf32>
    %20 = vector.broadcast %19 : vector<32x1xf32> to vector<32x64xf32>
    %21 = arith.mulf %18, %20 : vector<32x64xf32>
    %22 = arith.addf %15, %21 : vector<32x64xf32>
    %c2 = arith.constant 2 : index
    %c0_13 = arith.constant 0 : index
    %c0_14 = arith.constant 0 : index
    %23 = vector.load %arg2[%c2, %c0_13, %c0_14] : memref<4x64x64xbf16, #tpu.memory_space<vmem>>, vector<1x64x64xbf16>
    %24 = vector.shape_cast %23 : vector<1x64x64xbf16> to vector<64x64xbf16>
    %cst_15 = arith.constant dense<0.000000e+00> : vector<32x64xf32>
    %25 = tpu.matmul %1, %24, %cst_15 {dimension_numbers = #tpu.dot_dimension_numbers<[1], [0], [0], [1], [0, 0, 1, 1], [], []>} : vector<32x64xbf16>, vector<64x64xbf16>, vector<32x64xf32> -> vector<32x64xf32>
    %26 = vector.extract_strided_slice %9 {offsets = [0, 2], sizes = [32, 1], strides = [1, 1]} : vector<32x4xf32> to vector<32x1xf32>
    %27 = vector.broadcast %26 : vector<32x1xf32> to vector<32x64xf32>
    %28 = arith.mulf %25, %27 : vector<32x64xf32>
    %29 = arith.addf %22, %28 : vector<32x64xf32>
    %c3 = arith.constant 3 : index
    %c0_16 = arith.constant 0 : index
    %c0_17 = arith.constant 0 : index
    %30 = vector.load %arg2[%c3, %c0_16, %c0_17] : memref<4x64x64xbf16, #tpu.memory_space<vmem>>, vector<1x64x64xbf16>
    %31 = vector.shape_cast %30 : vector<1x64x64xbf16> to vector<64x64xbf16>
    %cst_18 = arith.constant dense<0.000000e+00> : vector<32x64xf32>
    %32 = tpu.matmul %1, %31, %cst_18 {dimension_numbers = #tpu.dot_dimension_numbers<[1], [0], [0], [1], [0, 0, 1, 1], [], []>} : vector<32x64xbf16>, vector<64x64xbf16>, vector<32x64xf32> -> vector<32x64xf32>
    %33 = vector.extract_strided_slice %9 {offsets = [0, 3], sizes = [32, 1], strides = [1, 1]} : vector<32x4xf32> to vector<32x1xf32>
    %34 = vector.broadcast %33 : vector<32x1xf32> to vector<32x64xf32>
    %35 = arith.mulf %32, %34 : vector<32x64xf32>
    %36 = arith.addf %29, %35 : vector<32x64xf32>
    %cst_19 = arith.constant dense<0xFF80> : vector<32xbf16>
    %37 = vector.multi_reduction <maximumf>, %1, %cst_19 [1] : vector<32x64xbf16> to vector<32xbf16>
    %38 = vector.shape_cast %37 : vector<32xbf16> to vector<32x1xbf16>
    %cst_20 = arith.constant 0.000000e+00 : bf16
    %39 = vector.broadcast %cst_20 : bf16 to vector<32x1xbf16>
    %40 = arith.cmpf ogt, %38, %39 : vector<32x1xbf16>
    %c0_21 = arith.constant 0 : index
    %c0_22 = arith.constant 0 : index
    %41 = vector.load %arg4[%c0_21, %c0_22] : memref<1x64xf32, #tpu.memory_space<vmem>>, vector<1x64xf32>
    %42 = vector.shape_cast %40 : vector<32x1xi1> to vector<32x1xi1>
    %43 = vector.broadcast %42 : vector<32x1xi1> to vector<32x64xi1>
    %44 = vector.shape_cast %41 : vector<1x64xf32> to vector<1x64xf32>
    %45 = vector.broadcast %44 : vector<1x64xf32> to vector<32x64xf32>
    %46 = arith.select %43, %36, %45 : vector<32x64xi1>, vector<32x64xf32>
    %c0_23 = arith.constant 0 : index
    %c0_24 = arith.constant 0 : index
    %47 = vector.load %arg5[%c0_23, %c0_24] : memref<32x64xf32, #tpu.memory_space<vmem>>, vector<32x64xf32>
    tpu.vector_store %arg5[%c0_23, %c0_24], %46 {strides = array<i32>} : memref<32x64xf32, #tpu.memory_space<vmem>>, vector<32x64xf32>,
    return
  }
  func.func @transform_0(%arg0: i32) -> (i32, i32) {
    %c0_i32 = arith.constant 0 : i32
    %c0_i32_0 = arith.constant 0 : i32
    return %arg0, %c0_i32 : i32, i32
  }
  func.func @transform_1(%arg0: i32) -> (i32, i32, i32) {
    %c0_i32 = arith.constant 0 : i32
    %c0_i32_0 = arith.constant 0 : i32
    %c0_i32_1 = arith.constant 0 : i32
    %c0_i32_2 = arith.constant 0 : i32
    return %c0_i32, %c0_i32_0, %c0_i32_1 : i32, i32, i32
  }
  func.func @transform_2(%arg0: i32) -> (i32, i32) {
    %c0_i32 = arith.constant 0 : i32
    %c0_i32_0 = arith.constant 0 : i32
    %c0_i32_1 = arith.constant 0 : i32
    return %c0_i32, %c0_i32_0 : i32, i32
  }
  func.func @transform_3(%arg0: i32) -> (i32, i32) {
    %c0_i32 = arith.constant 0 : i32
    %c0_i32_0 = arith.constant 0 : i32
    %c0_i32_1 = arith.constant 0 : i32
    return %c0_i32, %c0_i32_0 : i32, i32
  }
  func.func @transform_4(%arg0: i32) -> (i32, i32) {
    %c0_i32 = arith.constant 0 : i32
    %c0_i32_0 = arith.constant 0 : i32
    return %arg0, %c0_i32 : i32, i32
  }
}

</mosaic_0001>

<bundles_post_ra>
// kernel: tpu_custom_call.1
= control target key start
LH: loop header
LB: loop body
LE: loop exit
PB: predicated region body
PF: predicated region fallthrough
CT: control target
= control target key end

     0   :  { %9 = vsyncpa [#allocation3], 0  ;;  %s1529_s0 = inlined_call_operand.vmem [shape: s8[64,64], index: 0, kind: input, shape index: {}]   ;;  %s1530_s1 = inlined_call_operand.hbm [shape: bf16[4,64,64], index: 1, kind: input, shape index: {}]   ;;  %s1531_s2 = inlined_call_operand.vmem [shape: bf16[64,4], index: 2, kind: input, shape index: {}]   ;;  %s1532_s3 = inlined_call_operand.vmem [shape: f32[1,64], index: 3, kind: input, shape index: {}]   ;;  %s1533_s4 = inlined_call_operand.hbm [shape: f32[64,64], index: 4, kind: output, shape index: {}]  }
   0x1   :  { %10 = vsyncpa [#allocation4], 0 }
   0x2   :  { %12 = vsyncpa [#allocation4 + $0x1], 0  ;;  %s1296_s15 = smov 0   ;;  %s1298_s16 = smov 0  }
   0x3   :  { %s1300_s17 = smov 0   ;;  %s1302_s18 = smov 0  }
   0x4 LB: > { %s1317_s19 = sadd.s32 4294967295, %s1257_s18   ;;  %s923_s20 = sadd.s32 4294967294, %s1257_s18   ;;  %s1257_s18 = sphi %s1302_s18, %s1549_s18   ;;  %s1253_s17 = sphi %s1300_s17, %s1548_s17   ;;  %s1249_s16 = sphi %s1298_s16, %s1547_s16   ;;  %s1245_s15 = sphi %s1296_s15, %s1546_s15  }
   0x5   : > { %s1321_s21 = sadd.s32 1, %s1257_s18   ;;  %s114_s22 = sadd.s32 1, %s1253_s17 }
   0x6   : > { %s111_s23 = ssub.s32 %s1257_s18, %s1321_s21  ;;  %p124_p0 = scmp.ne.s32.totalorder %s1253_s17, %s1249_s16 }
   0x7   : > { %p112_p1 = scmp.eq.s32.totalorder %s111_s23, 0  ;;  %p125_p2 = scmp.eq.s32.totalorder %s1317_s19, 1 }
   0x8   : > { %p130_p3 = scmp.ne.s32.totalorder %s1249_s16, %s1245_s15  ;;  %p131_p4 = scmp.eq.s32.totalorder %s923_s20, 1 }
   0x9   : > { %s1332_s24 = scalar_select %p112_p1, %s1253_s17, %s114_s22  }
   0xa   : > { %p1334_p5 = por %p125_p2, %p124_p0  ;;  %p1338_p6 = por %p131_p4, %p130_p3 }
   0xb   : > { %p924_p7 = scmp.ge.s32.totalorder %s1257_s18, 1  ;;  %p138_p8 = scmp.lt.s32.totalorder %s1257_s18, 3 }
   0xc   : > { %s1537_s25 = scalar_select %p1334_p5, 1, 0 }
   0xd   : > { %s1538_s26 = scalar_select %p1338_p6, 1, 0 }
   0xe   : > { %p1534_p9 = scmp.eq.s32.totalorder %s1317_s19, 0  ;;  %p1345_p10 = pnand %p924_p7, %p138_p8 }
   0xf   : > { %s1259_s28 = smov [#allocation2]   ;;  %s1163_s7 = scalar_lea.hbm %s1530_s1, 2048 }
  0x10   : > { %s1539_s27 = scalar_select %p1345_p10, 1, 0 }
  0x11   : > { %s150_s29 = sshll.u32 %s1259_s28, 4  ;;  %p1064_p11 = pneg %p1345_p10  ;;  %s151_s29 = int_to_ptr.vmem [resolvable:$true] %s150_s29 }
  0x12   : > { %p1164_p13 = scmp.ne.s32.totalorder %s1530_s1, %s1163_s7  ;;  %p1170_p3 = scmp.lt.u32.totalorder %s1163_s7, %s1530_s1 }
  0x13   : > { %p1353_p12 = pnand %p1534_p9, %p1064_p11 }
  0x15   : > { %p1165_p0 = pneg %p1353_p12 }
  0x17   : > { %p1166_p1 = pnand %p1165_p0, %p1164_p13 }
  0x19   : > { %p1167_p2 = pneg %p1166_p1 }
  0x1b   : > { %p1172_p4 = pnand %p1170_p3, %p1167_p2 }
  0x1d   : > { %1175 = shalt.err (!%p1172_p4)
}
  0x1e   : > { %s1176_s12 = scalar_lea.vmem %s151_s29, 2048  ;;  %p1184_p9 = scmp.lt.s32.totalorder %s151_s29, %s151_s29 }
  0x1f   : > { %p1177_p7 = scmp.ne.s32.totalorder %s151_s29, %s1176_s12  ;;  %p1185_p6 = scmp.lt.s32.totalorder %s1176_s12, %s1176_s12 }
  0x21   : > { %p1179_p8 = pnand %p1177_p7, %p1165_p0  ;;  %p1186_p5 = por %p1185_p6, %p1184_p9 }
  0x23   : > { %p1180_p11 = pneg %p1179_p8 }
  0x25   : > { %p1187_p10 = pnand %p1186_p5, %p1180_p11 }
  0x27   : > { %1190 = shalt.err (!%p1187_p10)
}
  0x28   : > { %s1260_s13 = smov 64   ;;  %s1261_s14 = smov 4  }
  0x29   : > { %1067 = dma.hbm_to_vmem [thread:$0]  (!%p1353_p12), %s1530_s1, 2048, %s151_s29, [#allocation3], %s1260_s13, %s1260_s13, %s1261_s14  }
  0x2a   : > { %p1541_p13 = scmp.ne.s32.totalorder %s1539_s27, 0 }
  0x2b   : > { %p1542_p1 = scmp.eq.s32.totalorder (!%p1541_p13), %s1317_s19, 0 }
  0x2c   : > { %179 = sbr.rel (%p1541_p13) target bundleno = 516 (0x204), region = 36 }
  0x33   : > { %1236 = dma.done.wait (%p1542_p1), [#allocation3], 2048   ;;  %p1543_p0 = pmov %p1542_p1 }
  0x34   : > { %p204_p5 = scmp.lt.s32.totalorder %s1317_s19, 1  ;;  %v1135_v0 = vld [vmem:[%s1531_s2] sm:$0xff]   ;;  %v1136_v1 = vld [vmem:[%s1531_s2 + $0x8] sm:$0xff]   ;;  %v1137_v2 = vld [vmem:[%s1531_s2 + $0x10] sm:$0xff]   ;;  %vm248_vm0 = vcmask 523264   ;;  %v1262_v25 = vmov 0   ;;  %v760_v28 = vlaneseq }
  0x35   : > { %1238 = vsyncadd (%p1543_p0), [#allocation3], 4294965248  ;;  %998 = vmatprep.subr.bf16.mxu0 %v1135_v0  ;;  %v1139_v5 = vld [vmem:[#allocation2] sm:$0xff]   ;;  %v1138_v6 = vld [vmem:[%s1531_s2 + $0x18] sm:$0xff]   ;;  %1118 = vset.pattern.permute.xlu1 %v1262_v25  ;;  %v1263_v26 = vmov 839922192  }
  0x36   : > { %s205_s23 = scalar_select %p204_p5, %s1317_s19, 1  ;;  %999 = vmatpush3.bf16.msra.mxu0 %v1135_v0  ;;  %v1140_v8 = vld [vmem:[#allocation2 + $0x8] sm:$0xff]   ;;  %1010 = vmatprep.subr.bf16.mxu1 %v1139_v5  ;;  %v1142_v10 = vld [vmem:[#allocation2 + $0x10] sm:$0xff]   ;;  %v1141_v11 = vld [vmem:[#allocation2 + $0x20] sm:$0xff]   ;;  %v758_v27 = vunpack.c.l.s4 %v1263_v26  ;;  %v1264_v29 = vmov 1985246804  }
  0x37   : > { %1000 = vmatprep.subr.bf16.mxu0 %v1136_v1  ;;  %1011 = vmatpush3.bf16.msra.mxu1 %v1139_v5  ;;  %v1144_v13 = vld [vmem:[#allocation2 + $0x18] sm:$0xff]   ;;  %v1143_v14 = vld [vmem:[#allocation2 + $0x28] sm:$0xff]   ;;  %v1146_v15 = vld [vmem:[#allocation2 + $0x40] sm:$0xff]   ;;  %v765_v30 = vunpack.c.l.s4 %v1264_v29  ;;  %v761_v32 = vshrl.u32 %v760_v28, 7  ;;  %s201_s13 = sand.u32 1, %s1249_s16   ;;  %s967_s5 = sshll.u32 %s1317_s19, 9 }
  0x38   : > { %s930_s28 = sshll.u32 %s205_s23, 3  ;;  %1012 = vmatprep.subr.bf16.mxu1 %v1140_v8  ;;  %v1145_v16 = vld [vmem:[#allocation2 + $0x30] sm:$0xff]   ;;  %v1148_v17 = vld [vmem:[#allocation2 + $0x48] sm:$0xff]   ;;  %v1147_v18 = vld [vmem:[#allocation2 + $0x38] sm:$0xff]   ;;  %1126 = vset.pattern.permute.xlu0 %v1262_v25  ;;  %v759_v31 = vunpack.c.0.s8 %v758_v27  ;;  %s929_s14 = sshll.u32 %s201_s13, 5 }
  0x39   : > { %s207_s8 = scalar_lea.vmem %s1529_s0, %s930_s28  ;;  %v1150_v19 = vld [vmem:[#allocation2 + $0x50] sm:$0xff]   ;;  %v1149_v20 = vld [vmem:[#allocation2 + $0x60] sm:$0xff]   ;;  %v1152_v21 = vld [vmem:[#allocation2 + $0x58] sm:$0xff]   ;;  %v766_v33 = vunpack.c.0.s8 %v765_v30  ;;  %s1464_s23 = scalar_lea.vmem [#allocation5], %s929_s14 }
  0x3a   : > { %v213_v3 = vld [vmem:[%s207_s8] sm:$0xff]  ;;  %1001 = vmatpush3.bf16.msra.mxu0 %v1136_v1  ;;  %v1151_v22 = vld [vmem:[#allocation2 + $0x68] sm:$0xff]   ;;  %v1153_v23 = vld [vmem:[#allocation2 + $0x70] sm:$0xff]   ;;  %v1410_v34 = vsub.s32 %v759_v31, %v761_v32  ;;  %v1265_v1 = vmov 1   ;;  %s849_s28 = sshll.u32 %s1464_s23, 4  ;;  %s1480_s29 = scalar_lea.hbm %s1533_s4, %s967_s5  ;;  %s1475_s28 = int_to_ptr.vmem [resolvable:$true] %s849_s28 }
  0x3b   : > { %v214_v4 = vunpack.c.l.s8.bf16 %v213_v3  ;;  %1002 = vmatprep.subr.bf16.mxu0 %v1137_v2  ;;  %v215_v9 = vunpack.c.h.s8.bf16 %v213_v3  ;;  %1013 = vmatpush3.bf16.msra.mxu1 %v1140_v8  ;;  %v1154_v24 = vld [vmem:[#allocation2 + $0x78] sm:$0xff]   ;;  %v769_v35 = vsub.s32 %v766_v33, %v761_v32  ;;  %s1488_s19 = scalar_lea.sflag [#allocation4], %s201_s13  ;;  %s1191_s27 = scalar_lea.vmem %s1475_s28, 512 }
  0x3c   : > { %1014 = vmatprep.subr.bf16.mxu1 %v1142_v10  ;;  %p1192_p6 = scmp.ne.s32.totalorder %s1475_s28, %s1191_s27  ;;  %p1544_p9 = scmp.ne.s32.totalorder %s1537_s25, 0 }
  0x3d   : > { %1006 = vmatprep.mubr.msk.bf16.mxu0 %vm248_vm0, %v214_v4  ;;  %v744_v7 = vsel %vm248_vm0, %v214_v4, 4286644096  ;;  %1018 = vmatprep.mubr.msk.bf16.mxu1 %vm248_vm0, %v214_v4  ;;  %v748_v12 = vsel %vm248_vm0, %v215_v9, 4286644096  ;;  %s1268_s7 = smov [#allocation5]  }
  0x3e   : > { %746 = vmax.xlane.bf16.xlu0 %v744_v7  ;;  %1003 = vmatpush3.bf16.msra.mxu0 %v1137_v2  ;;  %v1266_v7 = vmov 2   ;;  %p1193_p10 = pnand %p1192_p6, %p1544_p9  ;;  %s1195_s8 = sshll.u32 %s1268_s7, 4  ;;  %s1196_s8 = int_to_ptr.vmem [resolvable:$false] %s1195_s8 }
  0x3f   : > { %1004 = vmatprep.subr.bf16.mxu0 %v1138_v6  ;;  %1015 = vmatpush3.bf16.msra.mxu1 %v1142_v10  ;;  %s1197_s9 = scalar_lea.vmem %s1196_s8, 1024  ;;  %p1198_p2 = scmp.lt.s32.totalorder %s1475_s28, %s1196_s8 }
  0x40   : > { %1016 = vmatprep.subr.bf16.mxu1 %v1144_v13  ;;  %p1194_p12 = pneg %p1193_p10  ;;  %p1199_p3 = scmp.lt.s32.totalorder %s1197_s9, %s1191_s27 }
  0x42   : > { %1005 = vmatpush3.bf16.msra.mxu0 %v1138_v6  ;;  %p1200_p4 = por %p1199_p3, %p1198_p2 }
  0x43   : > { %1022 = vmatprep.subr.bf16.mxu0 %v1141_v11  ;;  %1017 = vmatpush3.bf16.msra.mxu1 %v1144_v13 }
  0x44   : > { %1034 = vmatprep.subr.bf16.mxu1 %v1146_v15  ;;  %p1201_p7 = pnand %p1200_p4, %p1194_p12 }
  0x45   : > { %1007 = vmatmul.mubr.msk.bf16.vlgmr.msra.gmra.mrb[0].mxu0 %vm248_vm0, %v215_v9 }
  0x46   : > { %750 = vmax.xlane.bf16.xlu0 %v748_v12  ;;  %1023 = vmatpush3.bf16.msra.mxu0 %v1141_v11  ;;  %v1267_v11 = vmov 3  }
  0x47   : > { %1024 = vmatprep.subr.bf16.mxu0 %v1143_v14  ;;  %1030 = vmatprep.mubr.msk.bf16.mxu0 %vm248_vm0, %v214_v4 }
  0x48   : > { %1019 = vmatmul.mubr.msk.bf16.vlgmr.msra.gmra.mrb[0].mxu1 %vm248_vm0, %v215_v9 }
  0x49   : > { %1035 = vmatpush3.bf16.msra.mxu1 %v1146_v15  ;;  %1042 = vmatprep.mubr.msk.bf16.mxu1 %vm248_vm0, %v214_v4 }
  0x4a   : > { %1025 = vmatpush3.bf16.msra.mxu0 %v1143_v14  ;;  %1036 = vmatprep.subr.bf16.mxu1 %v1148_v17 }
  0x4b   : > { %1026 = vmatprep.subr.bf16.mxu0 %v1145_v16 }
  0x4d   : > { %1037 = vmatpush3.bf16.msra.mxu1 %v1148_v17 }
  0x4e   : > { %1027 = vmatpush3.bf16.msra.mxu0 %v1145_v16  ;;  %1038 = vmatprep.subr.bf16.mxu1 %v1150_v19 }
  0x4f   : > { %1028 = vmatprep.subr.bf16.mxu0 %v1147_v18 }
  0x51   : > { %1039 = vmatpush3.bf16.msra.mxu1 %v1150_v19 }
  0x52   : > { %1029 = vmatpush3.bf16.msra.mxu0 %v1147_v18  ;;  %1040 = vmatprep.subr.bf16.mxu1 %v1152_v21 }
  0x53   : > { %1046 = vmatprep.subr.bf16.mxu0 %v1149_v20 }
  0x55   : > { %1031 = vmatmul.mubr.msk.bf16.vlgmr.msra.gmra.mrb[4].mxu0 %vm248_vm0, %v215_v9  ;;  %1041 = vmatpush3.bf16.msra.mxu1 %v1152_v21 }
  0x56   : > { %1047 = vmatpush3.bf16.msra.mxu0 %v1149_v20  ;;  %1054 = vmatprep.mubr.msk.bf16.mxu0 %vm248_vm0, %v214_v4 }
  0x57   : > { %1048 = vmatprep.subr.bf16.mxu0 %v1151_v22 }
  0x58   : > { %1043 = vmatmul.mubr.msk.bf16.vlgmr.msra.gmra.mrb[4].mxu1 %vm248_vm0, %v215_v9 }
  0x5a   : > { %1049 = vmatpush3.bf16.msra.mxu0 %v1151_v22 }
  0x5b   : > { %1050 = vmatprep.subr.bf16.mxu0 %v1153_v23 }
  0x5e   : > { %1051 = vmatpush3.bf16.msra.mxu0 %v1153_v23 }
  0x5f   : > { %1052 = vmatprep.subr.bf16.mxu0 %v1154_v24 }
  0x62   : > { %1053 = vmatpush3.bf16.msra.mxu0 %v1154_v24 }
  0x65   : > { %1055 = vmatmul.mubr.msk.bf16.vlgmr.msra.gmra.mrb[8].mxu0 %vm248_vm0, %v215_v9 }
  0xcf   : > { %v747_v36 = vpop.xlane.xlu0 %746 }
  0xd0   : > { %vm752_vm1 = vcmp.gt.bf16.partialorder %v747_v36, 0 }
  0xd1   : > { %v755_v37 = vsel %vm752_vm1, 65537, %v1262_v25 }
  0xd2   : > { %v763_v38 = vrot.slane %v755_v37, %v1410_v34  ;;  %v770_v39 = vrot.slane %v755_v37, %v769_v35 }
  0xd4   : > { %vm785_vm2 = vcmp.ne.s16.totalorder %v763_v38, 0  ;;  %vm786_vm7 = vcmp.ne.s16.totalorder %v770_v39, 0 }
  0xd5   : > { %v789_v40 = vsel %vm785_vm2, 65537, %v1262_v25  ;;  %v790_v54 = vsel %vm786_vm7, 65537, %v1262_v25 }
  0xd6   : > { %v793_v41 = vunpack.c.l.b16 %v789_v40  ;;  %v794_v58 = vunpack.c.l.b16 %v790_v54 }
  0xd7   : > { %v751_v42 = vpop.xlane.xlu0 %750 }
  0xd8   : > { %vm797_vm3 = vcmp.ne.s32.totalorder %v793_v41, 0  ;;  %vm753_vm4 = vcmp.gt.bf16.partialorder %v751_v42, 0  ;;  %vm798_vm10 = vcmp.ne.s32.totalorder %v794_v58, 0 }
  0xd9   : > { %v801_v43 = vsel %vm797_vm3, 1, %v1262_v25  ;;  %v1417_v44 = vsel %vm753_vm4, 65537, %v1262_v25  ;;  %v802_v3 = vsel %vm798_vm10, 1, %v1262_v25 }
  0xda   : > { %806 = vperm.xlu1 %1118, %v801_v43   ;;  %v777_v45 = vrot.slane %v1417_v44, %v1410_v34  ;;  %v784_v52 = vrot.slane %v1417_v44, %v769_v35 }
  0xdc   : > { %vm788_vm8 = vcmp.ne.s16.totalorder %v784_v52, 0  ;;  %vm787_vm13 = vcmp.ne.s16.totalorder %v777_v45, 0 }
  0xdd   : > { %v792_v56 = vsel %vm788_vm8, 65537, %v1262_v25  ;;  %v791_v22 = vsel %vm787_vm13, 65537, %v1262_v25 }
  0xde   : > { %v796_v61 = vunpack.c.l.b16 %v792_v56  ;;  %v795_v24 = vunpack.c.l.b16 %v791_v22 }
  0xe0   : > { %vm800_vm11 = vcmp.ne.s32.totalorder %v796_v61, 0  ;;  %vm799_vm14 = vcmp.ne.s32.totalorder %v795_v24, 0 }
  0xe1   : > { %v804_v4 = vsel %vm800_vm11, 1, %v1262_v25  ;;  %v803_v27 = vsel %vm799_vm14, 1, %v1262_v25 }
 0x118   : > { %v1008_v46 = vpop.f32.mrb[0].mxu0 }
 0x119   : > { %vm306_vm5 = vcmp.gt.f32.partialorder %v1008_v46, 0.0  ;;  %v289_v47 = vpop.f32.mrb[1].mxu0 }
 0x11a   : > { %v310_v48 = vsel %vm306_vm5, %v1008_v46, 1.0  ;;  %v1009_v49 = vpop.f32.mrb[2].mxu0  ;;  %vm304_vm9 = vcmp.gt.f32.partialorder %v289_v47, 0.0 }
 0x11b   : > { %1155 = vrcp.f32 %v310_v48  ;;  %vm307_vm6 = vcmp.gt.f32.partialorder %v1009_v49, 0.0  ;;  %v292_v50 = vpop.f32.mrb[3].mxu0  ;;  %v1422_v53 = vpop.f32.mrb[0].mxu1  ;;  %v308_v0 = vsel %vm304_vm9, %v289_v47, 1.0 }
 0x11c   : > { %v311_v51 = vsel %vm307_vm6, %v1009_v49, 1.0  ;;  %v1426_v62 = vpop.f32.mrb[1].mxu1  ;;  %vm305_vm12 = vcmp.gt.f32.partialorder %v292_v50, 0.0  ;;  %v961_v49 = vld [vmem:[%s1532_s3] ss:$0 sm:$0xff] }
 0x11d   : > { %1157 = vrcp.f32 %v311_v51  ;;  %v1428_v63 = vpop.f32.mrb[2].mxu1  ;;  %v309_v17 = vsel %vm305_vm12, %v292_v50, 1.0 }
 0x11e   : > { %1159 = vrcp.f32 %v308_v0  ;;  %v1434_v5 = vpop.f32.mrb[3].mxu1 }
 0x11f   : > { %1161 = vrcp.f32 %v309_v17 }
 0x125   : > { %v1156_v55 = vpop.eup %1155 }
 0x126   : > { %v317_v57 = vmul.f32 0.25, %v1156_v55 }
 0x127   : > { %v1158_v59 = vpop.eup %1157 }
 0x128   : > { %v319_v60 = vmul.f32 0.25, %v1158_v59  ;;  %413 = vperm.xlu1 %1118, %v317_v57   ;;  %v1430_v2 = vpop.f32.mrb[4].mxu0  ;;  %v1160_v12 = vpop.eup %1159 }
 0x129   : > { %v1436_v8 = vpop.f32.mrb[5].mxu0  ;;  %v313_v14 = vmul.f32 0.25, %v1160_v12  ;;  %v1162_v20 = vpop.eup %1161 }
 0x12a   : > { %418 = vperm.xlu0 %1126, %v319_v60   ;;  %v1438_v9 = vpop.f32.mrb[6].mxu0  ;;  %v315_v21 = vmul.f32 0.25, %v1162_v20 }
 0x12b   : > { %v1044_v6 = vpop.f32.mrb[4].mxu1  ;;  %v1440_v10 = vpop.f32.mrb[7].mxu0 }
 0x12c   : > { %1119 = vset.pattern.permute.xlu1 %v1265_v1  ;;  %v598_v15 = vpop.f32.mrb[5].mxu1 }
 0x12d   : > { %516 = vperm.xlu1 %1119, %v317_v57   ;;  %v1045_v18 = vpop.f32.mrb[6].mxu1 }
 0x12e   : > { %809 = vperm.xlu0 %1126, %v802_v3   ;;  %v1448_v23 = vpop.f32.mrb[7].mxu1 }
 0x131   : > { %1120 = vset.pattern.permute.xlu1 %v1266_v7 }
 0x132   : > { %622 = vperm.xlu1 %1120, %v317_v57   ;;  %815 = vperm.xlu0 %1126, %v804_v4  }
 0x136   : > { %1121 = vset.pattern.permute.xlu1 %v1267_v11 }
 0x137   : > { %728 = vperm.xlu1 %1121, %v317_v57  }
 0x138   : > { %v1056_v13 = vpop.f32.mrb[8].mxu0 }
 0x139   : > { %v704_v16 = vpop.f32.mrb[9].mxu0 }
 0x13a   : > { %v1057_v19 = vpop.f32.mrb[10].mxu0 }
 0x13b   : > { %1122 = vset.pattern.permute.xlu1 %v1262_v25  ;;  %v707_v26 = vpop.f32.mrb[11].mxu0 }
 0x13c   : > { %403 = vperm.xlu1 %1122, %v313_v14  }
 0x140   : > { %1123 = vset.pattern.permute.xlu1 %v1265_v1 }
 0x141   : > { %508 = vperm.xlu1 %1123, %v313_v14  }
 0x145   : > { %1124 = vset.pattern.permute.xlu1 %v1266_v7 }
 0x146   : > { %614 = vperm.xlu1 %1124, %v313_v14  }
 0x14a   : > { %1125 = vset.pattern.permute.xlu1 %v1267_v11 }
 0x14b   : > { %720 = vperm.xlu1 %1125, %v313_v14  }
 0x14f   : > { %1127 = vset.pattern.permute.xlu1 %v1265_v1 }
 0x150   : > { %520 = vperm.xlu1 %1127, %v319_v60  }
 0x154   : > { %1128 = vset.pattern.permute.xlu1 %v1266_v7 }
 0x155   : > { %626 = vperm.xlu1 %1128, %v319_v60  }
 0x159   : > { %1129 = vset.pattern.permute.xlu1 %v1267_v11  ;;  %v807_v28 = vpop.permute.xlu1 %806 }
 0x15a   : > { %732 = vperm.xlu1 %1129, %v319_v60   ;;  %vm817_vm15 = vcmp.eq.s32.totalorder %v807_v28, 1 }
 0x15e   : > { %1130 = vset.pattern.permute.xlu1 %v1262_v25 }
 0x15f   : > { %408 = vperm.xlu1 %1130, %v315_v21  }
 0x163   : > { %1131 = vset.pattern.permute.xlu1 %v1265_v1 }
 0x164   : > { %512 = vperm.xlu1 %1131, %v315_v21  }
 0x168   : > { %1132 = vset.pattern.permute.xlu1 %v1266_v7 }
 0x169   : > { %618 = vperm.xlu1 %1132, %v315_v21  }
 0x16d   : > { %1133 = vset.pattern.permute.xlu1 %v1267_v11 }
 0x16e   : > { %724 = vperm.xlu1 %1133, %v315_v21  }
 0x172   : > { %1134 = vset.pattern.permute.xlu1 %v1262_v25 }
 0x173   : > { %812 = vperm.xlu1 %1134, %v803_v27  }
 0x1a7   : > { %v414_v29 = vpop.permute.xlu1 %413 }
 0x1a8   : > { %v423_v31 = vmul.f32 %v1422_v53, %v414_v29 }
 0x1a9   : > { %v419_v50 = vpop.permute.xlu0 %418 }
 0x1aa   : > { %v424_v54 = vmul.f32 %v1428_v63, %v419_v50 }
 0x1ac   : > { %v517_v30 = vpop.permute.xlu1 %516 }
 0x1ad   : > { %v525_v32 = vmul.f32 %v1430_v2, %v517_v30  ;;  %v810_v57 = vpop.permute.xlu0 %809 }
 0x1ae   : > { %vm818_vm2 = vcmp.eq.s32.totalorder %v810_v57, 1 }
 0x1af   : > { %v529_v33 = vadd.f32 %v525_v32, %v423_v31 }
 0x1b1   : > { %v623_v34 = vpop.permute.xlu1 %622  ;;  %v816_v61 = vpop.permute.xlu0 %815 }
 0x1b2   : > { %v631_v35 = vmul.f32 %v1044_v6, %v623_v34  ;;  %vm820_vm1 = vcmp.eq.s32.totalorder %v816_v61, 1 }
 0x1b4   : > { %v635_v36 = vadd.f32 %v631_v35, %v529_v33 }
 0x1b6   : > { %v729_v37 = vpop.permute.xlu1 %728 }
 0x1b7   : > { %v737_v38 = vmul.f32 %v1056_v13, %v729_v37 }
 0x1b9   : > { %v741_v39 = vadd.f32 %v737_v38, %v635_v36 }
 0x1bb   : > { %v404_v40 = vpop.permute.xlu1 %403 }
 0x1bc   : > { %v421_v25 = vmul.f32 %v404_v40, %v1426_v62 }
 0x1c0   : > { %v509_v41 = vpop.permute.xlu1 %508 }
 0x1c1   : > { %v523_v42 = vmul.f32 %v509_v41, %v1436_v8 }
 0x1c3   : > { %v527_v43 = vadd.f32 %v523_v42, %v421_v25 }
 0x1c5   : > { %v615_v44 = vpop.permute.xlu1 %614 }
 0x1c6   : > { %v629_v45 = vmul.f32 %v615_v44, %v598_v15 }
 0x1c8   : > { %v633_v46 = vadd.f32 %v629_v45, %v527_v43 }
 0x1ca   : > { %v721_v47 = vpop.permute.xlu1 %720 }
 0x1cb   : > { %v735_v48 = vmul.f32 %v721_v47, %v704_v16 }
 0x1cd   : > { %v739_v51 = vadd.f32 %v735_v48, %v633_v46 }
 0x1cf   : > { %v521_v52 = vpop.permute.xlu1 %520  ;;  %v827_v53 = vsel %vm817_vm15, %v739_v51, %v961_v49 }
 0x1d0   : > { %v526_v55 = vmul.f32 %v1438_v9, %v521_v52  ;;  %831 = vst.msk [vmem:[%s1464_s23] sm:$0xff] %vm248_vm0, %v827_v53 }
 0x1d2   : > { %v530_v56 = vadd.f32 %v526_v55, %v424_v54 }
 0x1d4   : > { %v627_v58 = vpop.permute.xlu1 %626 }
 0x1d5   : > { %v632_v59 = vmul.f32 %v1045_v18, %v627_v58 }
 0x1d7   : > { %v636_v60 = vadd.f32 %v632_v59, %v530_v56 }
 0x1d9   : > { %v733_v62 = vpop.permute.xlu1 %732 }
 0x1da   : > { %v738_v0 = vmul.f32 %v1057_v19, %v733_v62 }
 0x1dc   : > { %v742_v63 = vadd.f32 %v738_v0, %v636_v60 }
 0x1de   : > { %v830_v1 = vsel %vm820_vm1, %v742_v63, %v961_v49  ;;  %v409_v2 = vpop.permute.xlu1 %408 }
 0x1df   : > { %834 = vst.msk [vmem:[%s1464_s23 + $0x18] sm:$0xff] %vm248_vm0, %v830_v1  ;;  %v422_v4 = vmul.f32 %v409_v2, %v1434_v5 }
 0x1e3   : > { %v513_v3 = vpop.permute.xlu1 %512 }
 0x1e4   : > { %v524_v6 = vmul.f32 %v513_v3, %v1440_v10 }
 0x1e6   : > { %v528_v7 = vadd.f32 %v524_v6, %v422_v4 }
 0x1e8   : > { %v619_v8 = vpop.permute.xlu1 %618 }
 0x1e9   : > { %v630_v9 = vmul.f32 %v619_v8, %v1448_v23 }
 0x1eb   : > { %v634_v11 = vadd.f32 %v630_v9, %v528_v7 }
 0x1ed   : > { %v725_v12 = vpop.permute.xlu1 %724 }
 0x1ee   : > { %v736_v13 = vmul.f32 %v725_v12, %v707_v26 }
 0x1f0   : > { %v740_v14 = vadd.f32 %v736_v13, %v634_v11 }
 0x1f2   : > { %v828_v5 = vsel %vm818_vm2, %v740_v14, %v961_v49  ;;  %v813_v10 = vpop.permute.xlu1 %812 }
 0x1f3   : > { %832 = vst.msk [vmem:[%s1464_s23 + $0x8] sm:$0xff] %vm248_vm0, %v828_v5  ;;  %vm819_vm3 = vcmp.eq.s32.totalorder %v813_v10, 1 }
 0x1f4   : > { %v829_v15 = vsel %vm819_vm3, %v741_v39, %v961_v49 }
 0x1f5   : > { %833 = vst.msk [vmem:[%s1464_s23 + $0x10] sm:$0xff] %vm248_vm0, %v829_v15 }
 0x1f6   : > { %1204 = shalt.err (!%p1201_p7)
}
 0x1f7   : > { %s1205_s10 = scalar_lea.hbm %s1480_s29, 512  ;;  %s1209_s13 = scalar_lea.hbm %s1533_s4, 1024 }
 0x1f8   : > { %p1206_p8 = scmp.ne.s32.totalorder %s1480_s29, %s1205_s10  ;;  %p1210_p1 = scmp.lt.u32.totalorder %s1480_s29, %s1533_s4 }
 0x1f9   : > { %p1211_p0 = scmp.lt.u32.totalorder %s1209_s13, %s1205_s10  ;;  %p1213_p6 = scmp.lt.u32.totalorder %s1205_s10, %s1480_s29 }
 0x1fa   : > { %p1207_p11 = pnand %p1206_p8, %p1544_p9 }
 0x1fb   : > { %p1212_p5 = por %p1211_p0, %p1210_p1 }
 0x1fc   : > { %p1208_p13 = pneg %p1207_p11 }
 0x1fd   : > { %p1214_p10 = por %p1213_p6, %p1212_p5 }
 0x1ff   : > { %p1215_p12 = pnand %p1214_p10, %p1208_p13 }
 0x201   : > { %1218 = shalt.err (!%p1215_p12)
}
 0x202   : > { %s1269_s22 = smov 128   ;;  %s1270_s23 = smov 8  }
 0x203   : > { %1062 = dma.vmem_to_hbm [thread:$0]  (%p1544_p9), %s1475_s28, 512, %s1480_s29, %s1488_s19, %s1269_s22, %s1269_s22, %s1270_s23  }
 0x204 PF: > { %p1074_p2 = scmp.ge.s32.totalorder %s1257_s18, 2  ;;  %s864_s5 = sand.u32 1, %s1245_s15  }
 0x205   : > { %p1545_p3 = scmp.ne.s32.totalorder %s1538_s26, 0  ;;  %s865_s30 = scalar_lea.sflag [#allocation4], %s864_s5 }
 0x207   : > { %p1069_p4 = pnand %p1074_p2, %p1545_p3 }
 0x209   : > { %1240 = dma.done.wait (!%p1069_p4), %s865_s30, 512  }
 0x20a   : > { %1242 = vsyncadd (!%p1069_p4), %s865_s30, 4294966784  ;;  %p15_p7 = scmp.ge.s32.totalorder %s1321_s21, 4   ;;  %s1546_s15 = smov %s1249_s16 }
 0x20b   : > { %s1547_s16 = smov %s1253_s17  ;;  %s1548_s17 = smov %s1332_s24 }
 0x20c   : > { %s1549_s18 = smov %s1321_s21  ;;  %17 = sbr.rel (!%p15_p7) target bundleno = 4 (0x4), region = 79 }
 0x213   :  { %870 = vsyncpa [#allocation3], 1 }
 0x214   :  { %872 = vsyncpa [#allocation3 + $0x1], 1 }
 0x215   :  { %873 = vsyncpa [#allocation4], 1 }
 0x216   :  { %875 = vsyncpa [#allocation4 + $0x1], 1 }

</bundles_post_ra>
